<compile_context>
chip_gen: v5e
topology: v5e:2x2
jax: 0.10.0
libtpu: 0.0.40
codegen_flags: <defaults>
</compile_context>

<pallas_src>
import functools

import jax
import jax.numpy as jnp
import numpy as np
from jax import lax
from jax.experimental import pallas as pl
from jax.experimental.pallas import tpu as pltpu

ALPHA = 0.01
SCALE_FX = False  # matches the module's default scale_fx=False


def _dynamics_kernel(x_ref, w1T_ref, l2_ref, pvec_ref, rvT_ref, *,
                     D, H, alpha, scale_fx):
    xt = x_ref[...]                                     # (TB, D)   f32
    w1T = w1T_ref[...]                                  # (2H, D)   [Wf1^T ; Wv1^T]
    L2 = l2_ref[...]                                    # (2D+8, 3H) block-structured
    p = pvec_ref[...]                                   # (2H+D+1, 1) packed biases

    b1 = p[:2 * H, :]                                   # (2H, 1) = [bf1^T ; bv1^T]
    bf2 = p[2 * H:2 * H + D, :]                         # (D, 1)
    bv2 = p[2 * H + D:2 * H + D + 1, :]                 # (1, 1)

    # ---- fused first layers of fhat and V (single MXU matmul) -------------
    # (2H, D) x (TB, D) contracted on D -> (2H, TB): MXU consumes x^T directly,
    # no wrapper-side transpose and no in-kernel relayout of the batch tile.
    z = lax.dot_general(w1T, xt, (((1,), (1,)), ((), ())),
                        preferred_element_type=jnp.float32) + b1       # (2H, TB)
    t = jnp.tanh(z)                                     # rows: [h1 ; h]
    h = t[H:, :]                                        # (H, TB)

    # ---- single fused second-layer matmul ---------------------------------
    # slab rows: [h1 (H) ; h (H) ; 1-h^2 (H)]
    slab = jnp.concatenate([t, 1.0 - h * h], axis=0)                    # (3H, TB)
    out2 = jnp.dot(L2, slab, preferred_element_type=jnp.float32)        # (2D+8, TB)

    fx = out2[:D, :] + bf2                              # fhat(x)        (D, TB)
    gV = out2[D:2 * D, :]                               # dV/dx          (D, TB)
    Vx = out2[2 * D:2 * D + 1, :] + bv2                 # V(x)           (1, TB)

    if scale_fx:
        nrm = jnp.sqrt(jnp.sum(fx * fx, axis=0, keepdims=True))
        fx = fx / jnp.maximum(nrm, 1.0)

    # ---- Lyapunov projection ----------------------------------------------
    num = jnp.maximum(jnp.sum(gV * fx, axis=0, keepdims=True) + alpha * Vx,
                      0.0)                                              # (1, TB)
    den = jnp.sum(gV * gV, axis=0, keepdims=True) + 1e-12               # eps: no 0/0
    inv = pl.reciprocal(den, approx=True)               # EUP slot (VALU stays free)
    inv = inv * (2.0 - den * inv)                        # Newton step 1
    inv = inv * (2.0 - den * inv)                        # Newton step 2 (~f32 exact)
    rvT_ref[...] = (fx - gV * (num * inv)).astype(rvT_ref.dtype)


def _pick_batch_tile(Bp, cap=512):
    """Lane tile for a 128-multiple padded batch Bp.

    Multiple of 128, divides Bp, capped (vreg-spill pressure), and chosen so
    the grid has >= 2 steps whenever Bp >= 256 (keeps both v7x TCs busy).
    """
    tb = min(cap, Bp)
    if Bp >= 256:
        tb = min(tb, Bp // 2)
    tb = max(128, (tb // 128) * 128)
    while Bp % tb != 0:
        tb -= 128
    return tb


@functools.partial(jax.jit, static_argnames=("alpha", "scale_fx"))
def dynamics_forward(x, params, alpha=ALPHA, scale_fx=SCALE_FX):
    B, D = x.shape
    wf1, bf1, wf2, bf2, wv1, bv1, wv2, bv2 = params
    H = wf1.shape[1]
    f32 = jnp.float32

    # ---- pad batch to a multiple of 128 (lane-dense tiles, tiled path) -----
    Bp = pl.cdiv(B, 128) * 128
    xp = x.astype(f32)
    if Bp != B:
        xp = jnp.pad(xp, ((0, Bp - B), (0, 0)))

    TB = _pick_batch_tile(Bp)
    grid = (Bp // TB,)

    # ---- one-time operand packing (outside the kernel) ---------------------
    w1T = jnp.concatenate([wf1.T, wv1.T], axis=0).astype(f32)          # (2H, D)

    M2 = 2 * D + 8                                      # rows padded to x8
    L2 = jnp.zeros((M2, 3 * H), f32)
    L2 = L2.at[:D, :H].set(wf2.T.astype(f32))                          # fx  <- h1
    L2 = L2.at[D:2 * D, 2 * H:].set((wv1 * wv2.T).astype(f32))         # gV  <- 1-h^2
    L2 = L2.at[2 * D, H:2 * H].set(wv2[:, 0].astype(f32))              # Vx  <- h

    pvec = jnp.concatenate(
        [bf1.reshape(-1, 1), bv1.reshape(-1, 1),
         bf2.reshape(-1, 1), bv2.reshape(-1, 1)], axis=0).astype(f32)  # (2H+D+1, 1)
    P = pvec.shape[0]

    kernel = functools.partial(_dynamics_kernel, D=D, H=H,
                               alpha=alpha, scale_fx=scale_fx)

    rvT = pl.pallas_call(
        kernel,
        out_shape=jax.ShapeDtypeStruct((D, Bp), f32),
        grid=grid,
        in_specs=[
            pl.BlockSpec((TB, D), lambda i: (i, 0)),          # x batch tile (no wrapper x.T)
            pl.BlockSpec((2 * H, D), lambda i: (0, 0)),       # fused layer-1 weights
            pl.BlockSpec((M2, 3 * H), lambda i: (0, 0)),      # fused layer-2 block weights
            pl.BlockSpec((P, 1), lambda i: (0, 0)),           # packed biases
        ],
        out_specs=pl.BlockSpec((D, TB), lambda i: (0, i)),    # lane-dense output tile
        compiler_params=pltpu.CompilerParams(
            dimension_semantics=("parallel",),                # shard batch across TCs (v7x)
            vmem_limit_bytes=32 * 1024 * 1024),
    )(xp, w1T, L2, pvec)

    # Lane-dense (D, Bp) result; unpad + final transpose absorbed by XLA.
    return rvT[:, :B].T                                       # (B, D)


def reference_forward(x, params):
    """Pure-JAX reference mirroring the PyTorch semantics."""
    (wf1, bf1, wf2, bf2, wv1, bv1, wv2, bv2) = params
    h1 = jnp.tanh(x @ wf1 + bf1)
    fx = h1 @ wf2 + bf2
    if SCALE_FX:
        fx = fx / jnp.clip(jnp.linalg.norm(fx, axis=1, keepdims=True), 1.0, None)
    z = x @ wv1 + bv1
    h = jnp.tanh(z)
    Vx = h @ wv2 + bv2
    gV = ((1.0 - h * h) * wv2.T) @ wv1.T
    num = jax.nn.relu(jnp.sum(gV * fx, axis=1) + ALPHA * Vx[:, 0])
    den = jnp.sum(gV * gV, axis=1)
    return fx - gV * (num / den)[:, None]


if __name__ == "__main__":
    D, H = 16, 32

    key = jax.random.PRNGKey(0)
    ks = jax.random.split(key, 11)
    s = 0.3
    params = (
        s * jax.random.normal(ks[0], (D, H), jnp.float32),   # Wf1
        s * jax.random.normal(ks[1], (1, H), jnp.float32),   # bf1
        s * jax.random.normal(ks[2], (H, D), jnp.float32),   # Wf2
        s * jax.random.normal(ks[3], (1, D), jnp.float32),   # bf2
        s * jax.random.normal(ks[4], (D, H), jnp.float32),   # Wv1
        s * jax.random.normal(ks[5], (1, H), jnp.float32),   # bv1
        s * jax.random.normal(ks[6], (H, 1), jnp.float32),   # wv2
        s * jax.random.normal(ks[7], (1, 1), jnp.float32),   # bv2
    )

    # Three cases: tiny batch (padding path, single tile), a non-128-multiple
    # batch (padding + lane-dense stores), and a 128-multiple batch that
    # exercises the gridded, 2-step (megacore-shardable) pipelined path.
    for B, kx in ((8, ks[8]), (200, ks[9]), (256, ks[10])):
        x = jax.random.normal(kx, (B, D), jnp.float32)
        rv = jax.block_until_ready(dynamics_forward(x, params))
        rv_ref = reference_forward(x, params)
        np.testing.assert_allclose(np.asarray(rv), np.asarray(rv_ref),
                                   rtol=1e-5, atol=1e-5)

    print("KERNEL_OK")
</pallas_src>

<mosaic_0001>
module attributes {stable_mosaic.version = 11 : i64} {
  func.func @_dynamics_kernel(%arg0: i32, %arg1: memref<128x16xf32, #tpu.memory_space<vmem>>, %arg2: memref<64x16xf32, #tpu.memory_space<vmem>>, %arg3: memref<40x96xf32, #tpu.memory_space<vmem>>, %arg4: memref<81x1xf32, #tpu.memory_space<vmem>>, %arg5: memref<16x128xf32, #tpu.memory_space<vmem>>) attributes {dimension_semantics = [#tpu.dimension_semantics<parallel>], iteration_bounds = array<i64: 1>, scalar_prefetch = 0 : i64, scratch_operands = 0 : i64, tpu.core_type = #tpu.core_type<tc>, window_params = [{transform_indices = @transform_0, window_bounds = array<i64: 128, 16>}, {pipeline_mode = #tpu.pipeline_mode<synchronous>, transform_indices = @transform_1, window_bounds = array<i64: 64, 16>}, {pipeline_mode = #tpu.pipeline_mode<synchronous>, transform_indices = @transform_2, window_bounds = array<i64: 40, 96>}, {pipeline_mode = #tpu.pipeline_mode<synchronous>, transform_indices = @transform_3, window_bounds = array<i64: 81, 1>}, {transform_indices = @transform_4, window_bounds = array<i64: 16, 128>}]} {
    %c0 = arith.constant 0 : index
    %c0_0 = arith.constant 0 : index
    %0 = vector.load %arg1[%c0, %c0_0] : memref<128x16xf32, #tpu.memory_space<vmem>>, vector<128x16xf32>
    %c0_1 = arith.constant 0 : index
    %c0_2 = arith.constant 0 : index
    %1 = vector.load %arg2[%c0_1, %c0_2] : memref<64x16xf32, #tpu.memory_space<vmem>>, vector<64x16xf32>
    %c0_3 = arith.constant 0 : index
    %c0_4 = arith.constant 0 : index
    %2 = vector.load %arg3[%c0_3, %c0_4] : memref<40x96xf32, #tpu.memory_space<vmem>>, vector<40x96xf32>
    %c0_5 = arith.constant 0 : index
    %c0_6 = arith.constant 0 : index
    %3 = vector.load %arg4[%c0_5, %c0_6] : memref<81x1xf32, #tpu.memory_space<vmem>>, vector<81x1xf32>
    %4 = vector.extract_strided_slice %3 {offsets = [0, 0], sizes = [64, 1], strides = [1, 1]} : vector<81x1xf32> to vector<64x1xf32>
    %5 = vector.extract_strided_slice %3 {offsets = [64, 0], sizes = [16, 1], strides = [1, 1]} : vector<81x1xf32> to vector<16x1xf32>
    %6 = vector.extract_strided_slice %3 {offsets = [80, 0], sizes = [1, 1], strides = [1, 1]} : vector<81x1xf32> to vector<1x1xf32>
    %cst = arith.constant dense<0.000000e+00> : vector<64x128xf32>
    %7 = tpu.matmul %1, %0, %cst {dimension_numbers = #tpu.dot_dimension_numbers<[1], [1], [0], [0], [0, 0, 1, 0], [], []>} : vector<64x16xf32>, vector<128x16xf32>, vector<64x128xf32> -> vector<64x128xf32>
    %8 = vector.broadcast %4 : vector<64x1xf32> to vector<64x128xf32>
    %9 = arith.addf %7, %8 : vector<64x128xf32>
    %10 = math.tanh %9 : vector<64x128xf32>
    %11 = vector.extract_strided_slice %10 {offsets = [32, 0], sizes = [32, 128], strides = [1, 1]} : vector<64x128xf32> to vector<32x128xf32>
    %12 = arith.mulf %11, %11 : vector<32x128xf32>
    %cst_7 = arith.constant 1.000000e+00 : f32
    %13 = vector.broadcast %cst_7 : f32 to vector<32x128xf32>
    %14 = arith.subf %13, %12 : vector<32x128xf32>
    %15 = tpu.concatenate %10, %14 in 0 : vector<64x128xf32>, vector<32x128xf32> -> vector<96x128xf32>
    %cst_8 = arith.constant dense<0.000000e+00> : vector<40x128xf32>
    %16 = tpu.matmul %2, %15, %cst_8 {dimension_numbers = #tpu.dot_dimension_numbers<[1], [0], [0], [1], [0, 0, 1, 1], [], []>} : vector<40x96xf32>, vector<96x128xf32>, vector<40x128xf32> -> vector<40x128xf32>
    %17 = vector.extract_strided_slice %16 {offsets = [0, 0], sizes = [16, 128], strides = [1, 1]} : vector<40x128xf32> to vector<16x128xf32>
    %18 = vector.broadcast %5 : vector<16x1xf32> to vector<16x128xf32>
    %19 = arith.addf %17, %18 : vector<16x128xf32>
    %20 = vector.extract_strided_slice %16 {offsets = [16, 0], sizes = [16, 128], strides = [1, 1]} : vector<40x128xf32> to vector<16x128xf32>
    %21 = vector.extract_strided_slice %16 {offsets = [32, 0], sizes = [1, 128], strides = [1, 1]} : vector<40x128xf32> to vector<1x128xf32>
    %22 = vector.broadcast %6 : vector<1x1xf32> to vector<1x128xf32>
    %23 = arith.addf %21, %22 : vector<1x128xf32>
    %24 = arith.mulf %20, %19 : vector<16x128xf32>
    %cst_9 = arith.constant dense<0.000000e+00> : vector<128xf32>
    %25 = vector.multi_reduction <add>, %24, %cst_9 [0] : vector<16x128xf32> to vector<128xf32>
    %26 = vector.shape_cast %25 : vector<128xf32> to vector<1x128xf32>
    %cst_10 = arith.constant 0.00999999977 : f32
    %27 = vector.broadcast %cst_10 : f32 to vector<1x128xf32>
    %28 = arith.mulf %27, %23 : vector<1x128xf32>
    %29 = arith.addf %26, %28 : vector<1x128xf32>
    %cst_11 = arith.constant 0.000000e+00 : f32
    %30 = vector.broadcast %cst_11 : f32 to vector<1x128xf32>
    %31 = arith.maximumf %29, %30 : vector<1x128xf32>
    %32 = arith.mulf %20, %20 : vector<16x128xf32>
    %cst_12 = arith.constant dense<0.000000e+00> : vector<128xf32>
    %33 = vector.multi_reduction <add>, %32, %cst_12 [0] : vector<16x128xf32> to vector<128xf32>
    %34 = vector.shape_cast %33 : vector<128xf32> to vector<1x128xf32>
    %cst_13 = arith.constant 9.99999996E-13 : f32
    %35 = vector.broadcast %cst_13 : f32 to vector<1x128xf32>
    %36 = arith.addf %34, %35 : vector<1x128xf32>
    %37 = tpu.reciprocal %36 {approx = true} : vector<1x128xf32> -> vector<1x128xf32>
    %38 = arith.mulf %36, %37 : vector<1x128xf32>
    %cst_14 = arith.constant 2.000000e+00 : f32
    %39 = vector.broadcast %cst_14 : f32 to vector<1x128xf32>
    %40 = arith.subf %39, %38 : vector<1x128xf32>
    %41 = arith.mulf %37, %40 : vector<1x128xf32>
    %42 = arith.mulf %36, %41 : vector<1x128xf32>
    %cst_15 = arith.constant 2.000000e+00 : f32
    %43 = vector.broadcast %cst_15 : f32 to vector<1x128xf32>
    %44 = arith.subf %43, %42 : vector<1x128xf32>
    %45 = arith.mulf %41, %44 : vector<1x128xf32>
    %46 = arith.mulf %31, %45 : vector<1x128xf32>
    %47 = vector.broadcast %46 : vector<1x128xf32> to vector<16x128xf32>
    %48 = arith.mulf %20, %47 : vector<16x128xf32>
    %49 = arith.subf %19, %48 : vector<16x128xf32>
    %c0_16 = arith.constant 0 : index
    %c0_17 = arith.constant 0 : index
    %50 = vector.load %arg5[%c0_16, %c0_17] : memref<16x128xf32, #tpu.memory_space<vmem>>, vector<16x128xf32>
    tpu.vector_store %arg5[%c0_16, %c0_17], %49 {strides = array<i32>} : memref<16x128xf32, #tpu.memory_space<vmem>>, vector<16x128xf32>,
    return
  }
  func.func @transform_0(%arg0: i32) -> (i32, i32) {
    %c0_i32 = arith.constant 0 : i32
    %c0_i32_0 = arith.constant 0 : i32
    return %arg0, %c0_i32 : i32, i32
  }
  func.func @transform_1(%arg0: i32) -> (i32, i32) {
    %c0_i32 = arith.constant 0 : i32
    %c0_i32_0 = arith.constant 0 : i32
    %c0_i32_1 = arith.constant 0 : i32
    return %c0_i32, %c0_i32_0 : i32, i32
  }
  func.func @transform_2(%arg0: i32) -> (i32, i32) {
    %c0_i32 = arith.constant 0 : i32
    %c0_i32_0 = arith.constant 0 : i32
    %c0_i32_1 = arith.constant 0 : i32
    return %c0_i32, %c0_i32_0 : i32, i32
  }
  func.func @transform_3(%arg0: i32) -> (i32, i32) {
    %c0_i32 = arith.constant 0 : i32
    %c0_i32_0 = arith.constant 0 : i32
    %c0_i32_1 = arith.constant 0 : i32
    return %c0_i32, %c0_i32_0 : i32, i32
  }
  func.func @transform_4(%arg0: i32) -> (i32, i32) {
    %c0_i32 = arith.constant 0 : i32
    %c0_i32_0 = arith.constant 0 : i32
    return %c0_i32, %arg0 : i32, i32
  }
}

</mosaic_0001>

<bundles_post_ra>
// kernel: dynamics_forward.1
= control target key start
LH: loop header
LB: loop body
LE: loop exit
PB: predicated region body
PF: predicated region fallthrough
CT: control target
= control target key end

     0   :  { %vm97_vm0 = vcmask 130048   ;;  %v417_v12 = vmov 0   ;;  %vm227_vm1 = vcmask 785408   ;;  %s625_s0 = inlined_call_operand.vmem [shape: f32[128,16], index: 0, kind: input, shape index: {}]   ;;  %s626_s3 = inlined_call_operand.vmem [shape: f32[81,1], index: 3, kind: input, shape index: {}]   ;;  %s627_s1 = inlined_call_operand.vmem [shape: f32[64,16], index: 1, kind: input, shape index: {}]   ;;  %s628_s2 = inlined_call_operand.vmem [shape: f32[40,96], index: 2, kind: input, shape index: {}]   ;;  %s629_s4 = inlined_call_operand.vmem [shape: f32[16,128], index: 4, kind: output, shape index: {}]  }
   0x1   :  { %v32_v0 = vld [vmem:[%s625_s0 + $0x78] sm:$0xff]  ;;  %v31_v1 = vld [vmem:[%s625_s0 + $0x70] sm:$0xff]  ;;  %v30_v2 = vld [vmem:[%s625_s0 + $0x68] sm:$0xff]  ;;  %397 = vset.pattern.permute.xlu1 %v417_v12  ;;  %396 = vset.pattern.permute.xlu0 %v417_v12 }
   0x2   :  { %364 = vmatpush.xpose.msk.msra.mxu3 %vm97_vm0, %v32_v0  ;;  %363 = vmatpush.xpose.msk.msra.mxu2 %vm97_vm0, %v32_v0  ;;  %v29_v3 = vld [vmem:[%s625_s0 + $0x60] sm:$0xff]  ;;  %v28_v4 = vld [vmem:[%s625_s0 + $0x58] sm:$0xff]  ;;  %v27_v5 = vld [vmem:[%s625_s0 + $0x50] sm:$0xff] }
   0x3   :  { %334 = vmatpush.xpose.msk.msra.mxu0 %vm97_vm0, %v32_v0  ;;  %v26_v6 = vld [vmem:[%s625_s0 + $0x48] sm:$0xff]  ;;  %v25_v7 = vld [vmem:[%s625_s0 + $0x40] sm:$0xff]  ;;  %v24_v8 = vld [vmem:[%s625_s0 + $0x38] sm:$0xff]  ;;  %398 = vset.pattern.permute.xlu2 %v417_v12 }
   0x4   :  { %v23_v9 = vld [vmem:[%s625_s0 + $0x30] sm:$0xff]  ;;  %v22_v10 = vld [vmem:[%s625_s0 + $0x28] sm:$0xff]  ;;  %v21_v11 = vld [vmem:[%s625_s0 + $0x20] sm:$0xff] }
   0x5   :  { %v20_v13 = vld [vmem:[%s625_s0 + $0x18] sm:$0xff]  ;;  %v51_v14 = vld [vmem:[%s626_s3 + $0x28] sm:$0xff]  ;;  %v19_v16 = vld [vmem:[%s625_s0 + $0x10] sm:$0xff] }
   0x6   :  { %366 = vmatpush.xpose.msk.msra.mxu3 %vm97_vm0, %v31_v1  ;;  %365 = vmatpush.xpose.msk.msra.mxu2 %vm97_vm0, %v31_v1  ;;  %v53_v15 = vld [vmem:[%s626_s3 + $0x38] sm:$0xff]  ;;  %v18_v17 = vld [vmem:[%s625_s0 + $0x8] sm:$0xff]  ;;  %v50_v18 = vld [vmem:[%s626_s3 + $0x20] sm:$0xff] }
   0x7   :  { %335 = vmatpush.xpose.msk.msra.mxu0 %vm97_vm0, %v31_v1  ;;  %84 = vperm.xlu1 %397, %v51_v14   ;;  %v52_v19 = vld [vmem:[%s626_s3 + $0x30] sm:$0xff]  ;;  %v17_v20 = vld [vmem:[%s625_s0] sm:$0xff]  ;;  %v36_v21 = vld [vmem:[%s627_s1 + $0x18] sm:$0xff] }
   0x8   :  { %94 = vperm.xlu0 %396, %v53_v15   ;;  %v34_v22 = vld [vmem:[%s627_s1 + $0x8] sm:$0xff]  ;;  %v33_v24 = vld [vmem:[%s627_s1] sm:$0xff]  ;;  %v49_v26 = vld [vmem:[%s626_s3 + $0x18] sm:$0xff] }
   0x9   :  { %v47_v23 = vld [vmem:[%s626_s3 + $0x8] sm:$0xff]  ;;  %v46_v25 = vld [vmem:[%s626_s3] sm:$0xff]  ;;  %74 = vperm.xlu2 %398, %v49_v26   ;;  %v35_v28 = vld [vmem:[%s627_s1 + $0x10] sm:$0xff] }
   0xa   :  { %368 = vmatpush.xpose.msk.msra.mxu3 %vm97_vm0, %v30_v2  ;;  %367 = vmatpush.xpose.msk.msra.mxu2 %vm97_vm0, %v30_v2  ;;  %v37_v27 = vld [vmem:[%s627_s1 + $0x20] sm:$0xff]  ;;  %v55_v29 = vld [vmem:[%s626_s3 + $0x48] sm:$0xff]  ;;  %v56_v30 = vld [vmem:[%s626_s3 + $0x50] sm:$0x1] }
   0xb   :  { %336 = vmatpush.xpose.msk.msra.mxu0 %vm97_vm0, %v30_v2  ;;  %v48_v31 = vld [vmem:[%s626_s3 + $0x10] sm:$0xff]  ;;  %v38_v32 = vld [vmem:[%s627_s1 + $0x28] sm:$0xff]  ;;  %v54_v33 = vld [vmem:[%s626_s3 + $0x40] sm:$0xff] }
   0xc   :  { %v39_v34 = vld [vmem:[%s627_s1 + $0x30] sm:$0xff]  ;;  %v40_v35 = vld [vmem:[%s627_s1 + $0x38] sm:$0xff] }
   0xd   :  { %v43_v14 = vld [vmem:[%s628_s2 + $0x10] sm:$0xff]  ;;  %v44_v15 = vld [vmem:[%s628_s2 + $0x18] sm:$0xff] }
   0xe   :  { %370 = vmatpush.xpose.msk.msra.mxu3 %vm97_vm0, %v29_v3  ;;  %369 = vmatpush.xpose.msk.msra.mxu2 %vm97_vm0, %v29_v3 }
   0xf   :  { %337 = vmatpush.xpose.msk.msra.mxu0 %vm97_vm0, %v29_v3  ;;  %79 = vperm.xlu1 %397, %v50_v18  }
  0x10   :  { %89 = vperm.xlu0 %396, %v52_v19  }
  0x11   :  { %69 = vperm.xlu2 %398, %v48_v31  }
  0x12   :  { %372 = vmatpush.xpose.msk.msra.mxu3 %vm97_vm0, %v28_v4  ;;  %371 = vmatpush.xpose.msk.msra.mxu2 %vm97_vm0, %v28_v4 }
  0x13   :  { %338 = vmatpush.xpose.msk.msra.mxu0 %vm97_vm0, %v28_v4 }
  0x16   :  { %374 = vmatpush.xpose.msk.msra.mxu3 %vm97_vm0, %v27_v5  ;;  %373 = vmatpush.xpose.msk.msra.mxu2 %vm97_vm0, %v27_v5 }
  0x17   :  { %339 = vmatpush.xpose.msk.msra.mxu0 %vm97_vm0, %v27_v5  ;;  %59 = vperm.xlu1 %397, %v46_v25  }
  0x18   :  { %64 = vperm.xlu0 %396, %v47_v23  }
  0x19   :  { %277 = vperm.xlu2 %398, %v54_v33  }
  0x1a   :  { %376 = vmatpush.xpose.msk.msra.mxu3 %vm97_vm0, %v26_v6  ;;  %375 = vmatpush.xpose.msk.msra.mxu2 %vm97_vm0, %v26_v6 }
  0x1b   :  { %340 = vmatpush.xpose.msk.msra.mxu0 %vm97_vm0, %v26_v6 }
  0x1e   :  { %378 = vmatpush.xpose.msk.msra.mxu3 %vm97_vm0, %v25_v7  ;;  %377 = vmatpush.xpose.msk.msra.mxu2 %vm97_vm0, %v25_v7 }
  0x1f   :  { %341 = vmatpush.xpose.msk.msra.mxu0 %vm97_vm0, %v25_v7  ;;  %289 = vperm.xlu1 %397, %v56_v30  }
  0x20   :  { %282 = vperm.xlu0 %396, %v55_v29  }
  0x22   :  { %380 = vmatpush.xpose.msk.msra.mxu3 %vm97_vm0, %v24_v8  ;;  %379 = vmatpush.xpose.msk.msra.mxu2 %vm97_vm0, %v24_v8 }
  0x23   :  { %342 = vmatpush.xpose.msk.msra.mxu0 %vm97_vm0, %v24_v8 }
  0x26   :  { %382 = vmatpush.xpose.msk.msra.mxu3 %vm97_vm0, %v23_v9  ;;  %381 = vmatpush.xpose.msk.msra.mxu2 %vm97_vm0, %v23_v9 }
  0x27   :  { %343 = vmatpush.xpose.msk.msra.mxu0 %vm97_vm0, %v23_v9 }
  0x2a   :  { %384 = vmatpush.xpose.msk.msra.mxu3 %vm97_vm0, %v22_v10  ;;  %383 = vmatpush.xpose.msk.msra.mxu2 %vm97_vm0, %v22_v10 }
  0x2b   :  { %344 = vmatpush.xpose.msk.msra.mxu0 %vm97_vm0, %v22_v10 }
  0x2e   :  { %386 = vmatpush.xpose.msk.msra.mxu3 %vm97_vm0, %v21_v11  ;;  %385 = vmatpush.xpose.msk.msra.mxu2 %vm97_vm0, %v21_v11 }
  0x2f   :  { %345 = vmatpush.xpose.msk.msra.mxu0 %vm97_vm0, %v21_v11  ;;  %v41_v11 = vld [vmem:[%s628_s2] sm:$0xff] }
  0x32   :  { %388 = vmatpush.xpose.msk.msra.mxu3 %vm97_vm0, %v20_v13  ;;  %387 = vmatpush.xpose.msk.msra.mxu2 %vm97_vm0, %v20_v13 }
  0x33   :  { %346 = vmatpush.xpose.msk.msra.mxu0 %vm97_vm0, %v20_v13  ;;  %v42_v13 = vld [vmem:[%s628_s2 + $0x8] sm:$0xff] }
  0x36   :  { %390 = vmatpush.xpose.msk.msra.mxu3 %vm97_vm0, %v19_v16  ;;  %389 = vmatpush.xpose.msk.msra.mxu2 %vm97_vm0, %v19_v16 }
  0x37   :  { %347 = vmatpush.xpose.msk.msra.mxu0 %vm97_vm0, %v19_v16  ;;  %v45_v16 = vld [vmem:[%s628_s2 + $0x20] sm:$0xff] }
  0x3a   :  { %392 = vmatpush.xpose.msk.msra.mxu3 %vm97_vm0, %v18_v17  ;;  %391 = vmatpush.xpose.msk.msra.mxu2 %vm97_vm0, %v18_v17 }
  0x3b   :  { %348 = vmatpush.xpose.msk.msra.mxu0 %vm97_vm0, %v18_v17 }
  0x3e   :  { %394 = vmatpush.xpose.msk.msra.mxu3 %vm97_vm0, %v17_v20  ;;  %393 = vmatpush.xpose.msk.msra.mxu2 %vm97_vm0, %v17_v20 }
  0x3f   :  { %349 = vmatpush.xpose.msk.msra.mxu0 %vm97_vm0, %v17_v20 }
  0x41   :  { %353 = vmatmul.msk.f32.vlgmr.msra.gmra.mxu3 %vm97_vm0, %v36_v21  ;;  %351 = vmatmul.msk.f32.vlgmr.msra.gmra.mxu2 %vm97_vm0, %v34_v22 }
  0x42   :  { %350 = vmatmul.msk.f32.vlgmr.msra.gmra.mxu0 %vm97_vm0, %v33_v24 }
  0x49   :  { %354 = vmatmul.msk.f32.gmra.mxu3 %vm97_vm0, %v37_v27  ;;  %352 = vmatmul.msk.f32.gmra.mxu2 %vm97_vm0, %v35_v28 }
  0x51   :  { %355 = vmatmul.msk.f32.gmra.mxu3 %vm97_vm0, %v38_v32 }
  0x59   :  { %356 = vmatmul.msk.f32.gmra.mxu3 %vm97_vm0, %v39_v34 }
  0x61   :  { %357 = vmatmul.msk.f32.gmra.mxu3 %vm97_vm0, %v40_v35 }
  0x63   :  { %v75_v56 = vpop.permute.xlu2 %74 }
  0x6b   :  { %v70_v1 = vpop.permute.xlu2 %69 }
  0x73   :  { %v278_v21 = vpop.permute.xlu2 %277 }
  0x79   :  { %v85_v40 = vpop.permute.xlu1 %84 }
  0x7a   :  { %v95_v39 = vpop.permute.xlu0 %94 }
  0x81   :  { %v80_v44 = vpop.permute.xlu1 %79 }
  0x82   :  { %v90_v42 = vpop.permute.xlu0 %89 }
  0x89   :  { %v60_v6 = vpop.permute.xlu1 %59 }
  0x8a   :  { %v65_v3 = vpop.permute.xlu0 %64 }
  0x92   :  { %v283_v20 = vpop.permute.xlu0 %282 }
  0xbf   :  { %v187_v4 = vpop.f32.mrf.mxu0 }
  0xc0   :  { %v188_v7 = vadd.f32 %v187_v4, %v60_v6 }
  0xc4   :  { %v196_v36 = vpop.f32.mrf.mxu3  ;;  %v190_v52 = vpop.f32.mrf.mxu2 }
  0xc5   :  { %v197_v0 = vadd.f32 %v196_v36, %v75_v56  ;;  %v191_v5 = vadd.f32 %v190_v52, %v65_v3 }
  0xcc   :  { %v199_v37 = vpop.f32.mrf.mxu3  ;;  %v193_v62 = vpop.f32.mrf.mxu2 }
  0xcd   :  { %v200_v47 = vadd.f32 %v199_v37, %v80_v44  ;;  %v194_v2 = vadd.f32 %v193_v62, %v70_v1 }
  0xd4   :  { %v202_v38 = vpop.f32.mrf.mxu3 }
  0xd5   :  { %v203_v45 = vadd.f32 %v202_v38, %v85_v40 }
  0xdc   :  { %v205_v41 = vpop.f32.mrf.mxu3 }
  0xdd   :  { %v206_v43 = vadd.f32 %v205_v41, %v90_v42 }
  0xdf   :  { %399 = vtanh.f32 %v206_v43 }
  0xe0   :  { %401 = vtanh.f32 %v203_v45  ;;  %v290_v45 = vpop.permute.xlu1 %289 }
  0xe4   :  { %v208_v46 = vpop.f32.mrf.mxu3 }
  0xe5   :  { %v209_v48 = vadd.f32 %v208_v46, %v95_v39  ;;  %v400_v49 = vpop.eup %399 }
  0xe6   :  { %v402_v50 = vpop.eup %401  ;;  %v221_v54 = vmul.f32 %v400_v49, %v400_v49 }
  0xe7   :  { %403 = vtanh.f32 %v209_v48  ;;  %v220_v58 = vmul.f32 %v402_v50, %v402_v50 }
  0xe8   :  { %405 = vtanh.f32 %v200_v47  ;;  %v225_v59 = vsub.f32 1.0, %v221_v54 }
  0xe9   :  { %v224_v61 = vsub.f32 1.0, %v220_v58  ;;  %407 = vtanh.f32 %v197_v0 }
  0xea   :  { %409 = vtanh.f32 %v194_v2 }
  0xeb   :  { %411 = vtanh.f32 %v191_v5 }
  0xec   :  { %413 = vtanh.f32 %v188_v7 }
  0xed   :  { %v404_v51 = vpop.eup %403 }
  0xee   :  { %v222_v53 = vmul.f32 %v404_v51, %v404_v51  ;;  %v406_v55 = vpop.eup %405 }
  0xef   :  { %v219_v60 = vmul.f32 %v406_v55, %v406_v55  ;;  %v408_v8 = vpop.eup %407 }
  0xf0   :  { %v226_v57 = vsub.f32 1.0, %v222_v53  ;;  %v410_v9 = vpop.eup %409 }
  0xf1   :  { %v223_v63 = vsub.f32 1.0, %v219_v60  ;;  %v412_v10 = vpop.eup %411 }
  0xf2   :  { %247 = vmatpush.msra.mxu1 %v226_v57  ;;  %v414_v12 = vpop.eup %413 }
  0xf4   :  { %248 = vmatpush.msra.mxu1 %v225_v59 }
  0xf6   :  { %249 = vmatpush.msra.mxu1 %v224_v61 }
  0xf8   :  { %250 = vmatpush.msra.mxu1 %v223_v63 }
  0xfa   :  { %251 = vmatpush.msra.mxu1 %v404_v51 }
  0xfc   :  { %252 = vmatpush.msra.mxu1 %v400_v49 }
  0xfe   :  { %253 = vmatpush.msra.mxu1 %v402_v50 }
 0x100   :  { %254 = vmatpush.msra.mxu1 %v406_v55 }
 0x102   :  { %255 = vmatpush.msra.mxu1 %v408_v8 }
 0x104   :  { %256 = vmatpush.msra.mxu1 %v410_v9 }
 0x106   :  { %257 = vmatpush.msra.mxu1 %v412_v10 }
 0x108   :  { %258 = vmatpush.msra.mxu1 %v414_v12 }
 0x109   :  { %358 = vmatmul.msk.f32.vlgmr.msra.gmra.mxu1 %vm227_vm1, %v41_v11 }
 0x111   :  { %359 = vmatmul.msk.f32.gmra.mxu1 %vm227_vm1, %v42_v13 }
 0x119   :  { %360 = vmatmul.msk.f32.gmra.mxu1 %vm227_vm1, %v43_v14 }
 0x121   :  { %361 = vmatmul.msk.f32.gmra.mxu1 %vm227_vm1, %v44_v15 }
 0x129   :  { %362 = vmatmul.msk.f32.gmra.mxu1 %vm227_vm1, %v45_v16 }
 0x186   :  { %v260_v17 = vpop.f32.mrf.mxu1 }
 0x187   :  { %v285_v23 = vadd.f32 %v278_v21, %v260_v17 }
 0x18e   :  { %v263_v18 = vpop.f32.mrf.mxu1 }
 0x18f   :  { %v286_v22 = vadd.f32 %v283_v20, %v263_v18 }
 0x196   :  { %v266_v19 = vpop.f32.mrf.mxu1 }
 0x197   :  { %v305_v25 = vmul.f32 %v266_v19, %v266_v19  ;;  %v293_v28 = vmul.f32 %v285_v23, %v266_v19 }
 0x19e   :  { %v269_v24 = vpop.f32.mrf.mxu1 }
 0x19f   :  { %v294_v26 = vmul.f32 %v286_v22, %v269_v24  ;;  %v306_v27 = vmul.f32 %v269_v24, %v269_v24 }
 0x1a1   :  { %v307_v29 = vadd.f32 %v306_v27, %v305_v25  ;;  %v295_v30 = vadd.f32 %v294_v26, %v293_v28 }
 0x1a3   :  { %v308_v31 = vrot.slane %v307_v29, 4  ;;  %v296_v33 = vrot.slane %v295_v30, 4 }
 0x1a5   :  { %v309_v32 = vadd.f32 %v308_v31, %v307_v29  ;;  %v297_v36 = vadd.f32 %v296_v33, %v295_v30 }
 0x1a6   :  { %v272_v42 = vpop.f32.mrf.mxu1 }
 0x1a7   :  { %v310_v34 = vrot.slane %v309_v32, 2  ;;  %v298_v39 = vrot.slane %v297_v36, 2  ;;  %v292_v46 = vadd.f32 %v290_v45, %v272_v42 }
 0x1a9   :  { %v311_v35 = vadd.f32 %v310_v34, %v309_v32  ;;  %v299_v41 = vadd.f32 %v298_v39, %v297_v36  ;;  %v302_v50 = vmul.f32 0.01, %v292_v46 }
 0x1ab   :  { %v312_v37 = vrot.slane %v311_v35, 1  ;;  %v300_v43 = vrot.slane %v299_v41, 1 }
 0x1ad   :  { %v313_v38 = vadd.f32 %v312_v37, %v311_v35  ;;  %v301_v48 = vadd.f32 %v300_v43, %v299_v41 }
 0x1af   :  { %v314_v40 = vadd.f32 1e-12, %v313_v38  ;;  %v303_v52 = vadd.f32 %v302_v50, %v301_v48 }
 0x1b1   :  { %415 = vrcp.f32 %v314_v40  ;;  %v304_v55 = vmax.f32 %v303_v52, 0.0 }
 0x1b7   :  { %v416_v44 = vpop.eup %415 }
 0x1b8   :  { %v316_v47 = vmul.f32 %v416_v44, %v314_v40 }
 0x1ba   :  { %v317_v49 = vsub.f32 2.0, %v316_v47 }
 0x1bc   :  { %v318_v51 = vmul.f32 %v416_v44, %v317_v49 }
 0x1be   :  { %v319_v53 = vmul.f32 %v318_v51, %v314_v40 }
 0x1c0   :  { %v320_v54 = vsub.f32 2.0, %v319_v53 }
 0x1c2   :  { %v321_v56 = vmul.f32 %v320_v54, %v318_v51 }
 0x1c4   :  { %v322_v57 = vmul.f32 %v321_v56, %v304_v55 }
 0x1c6   :  { %v323_v58 = vperm.slane %v322_v57, 0 }
 0x1c8   :  { %v324_v59 = vmul.f32 %v323_v58, %v266_v19  ;;  %v325_v60 = vmul.f32 %v323_v58, %v269_v24 }
 0x1ca   :  { %v326_v61 = vsub.f32 %v285_v23, %v324_v59  ;;  %v327_v62 = vsub.f32 %v286_v22, %v325_v60 }
 0x1cc   :  { %328 = vst [vmem:[%s629_s4] sm:$0xff] %v326_v61 }
 0x1cd   :  { %329 = vst [vmem:[%s629_s4 + $0x8] sm:$0xff] %v327_v62 }

</bundles_post_ra>
